<compile_context>
chip_gen: v7x
topology: tpu7x:2x2x1
jax: 0.10.0
libtpu: 0.0.40
codegen_flags: <defaults>
</compile_context>

<pallas_src>
import jax
import jax.numpy as jnp
from jax.experimental import pallas as pl
from jax.experimental.pallas import tpu as pltpu


def _multy_inputs_kernel(w1_ref, w2_ref, b_ref, x_ref, y_ref, o_ref):
    """out[c, :] = sum_k w1[c,k]*x[k,:] + w2[c,k]*y[k,:] + (b1+b2)[c].

    w1_ref / w2_ref: (C, C) f32 in SMEM.
    b_ref:           (C,)   f32 in SMEM (bias already folded host-side).
    x_ref / y_ref / o_ref: (C, TM) f32 VMEM tiles (batch dim squeezed away).

    C is tiny (2 for this module), so channel mixing is done with
    scalar-broadcast VPU FMAs instead of feeding a 2x2 matmul to the MXU.
    """
    C = o_ref.shape[0]
    # Load each input channel row once (full-width, lane-dense (1, TM) slabs).
    xrows = [x_ref[pl.ds(c, 1), :] for c in range(C)]
    yrows = [y_ref[pl.ds(c, 1), :] for c in range(C)]
    for co in range(C):  # static unroll (C == 2)
        acc = xrows[0] * w1_ref[co, 0] + yrows[0] * w2_ref[co, 0] + b_ref[co]
        for ci in range(1, C):
            acc = acc + xrows[ci] * w1_ref[co, ci] + yrows[ci] * w2_ref[co, ci]
        o_ref[pl.ds(co, 1), :] = acc.astype(o_ref.dtype)


def multy_inputs(x, y, w1, b1, w2, b2, *, tm=None):
    """x, y: (N, C, H, W) float32.  w*: (C, C) (1x1 conv kernels squeezed), b*: (C,)."""
    N, C, H, W = x.shape
    HW = H * W

    # Tile selection: full row if it fits the target, otherwise a large
    # multiple of 128 with a masked ragged tail (no divisibility requirement).
    target = 8192
    if tm is None:
        tm = HW if HW <= target else target
    if tm != HW:
        tm = max(128, (tm // 128) * 128)
    num_tiles = pl.cdiv(HW, tm)

    # NCHW -> (N, C, H*W): contiguity-preserving, no HBM transpose traffic.
    x3 = x.reshape(N, C, HW)
    y3 = y.reshape(N, C, HW)
    b = (b1 + b2).astype(x.dtype)  # fold the two biases host-side

    data_spec = pl.BlockSpec((None, C, tm), lambda n, j: (n, 0, j))
    smem_spec = pl.BlockSpec(memory_space=pltpu.MemorySpace.SMEM)

    out3 = pl.pallas_call(
        _multy_inputs_kernel,
        out_shape=jax.ShapeDtypeStruct((N, C, HW), x.dtype),
        grid_spec=pltpu.PrefetchScalarGridSpec(
            num_scalar_prefetch=0,
            grid=(N, num_tiles),
            in_specs=[smem_spec, smem_spec, smem_spec, data_spec, data_spec],
            out_specs=data_spec,
        ),
        compiler_params=pltpu.CompilerParams(
            dimension_semantics=("parallel", "parallel")),
    )(w1, w2, b, x3, y3)

    return out3.reshape(N, C, H, W)


if __name__ == "__main__":
    key = jax.random.PRNGKey(0)
    kx, ky, kw1, kb1, kw2, kb2 = jax.random.split(key, 6)

    N, C, H, W = 2, 2, 16, 16
    x = jax.random.normal(kx, (N, C, H, W), dtype=jnp.float32)
    y = jax.random.normal(ky, (N, C, H, W), dtype=jnp.float32)

    # 1x1 conv weights (out_c, in_c, 1, 1) -> squeeze to (out_c, in_c)
    w1 = jax.random.normal(kw1, (C, C), dtype=jnp.float32) * 0.5
    b1 = jax.random.normal(kb1, (C,), dtype=jnp.float32) * 0.1
    w2 = jax.random.normal(kw2, (C, C), dtype=jnp.float32) * 0.5
    b2 = jax.random.normal(kb2, (C,), dtype=jnp.float32) * 0.1

    out = jax.jit(multy_inputs)(x, y, w1, b1, w2, b2)
    jax.block_until_ready(out)

    # Pure-JAX reference (1x1 conv == channel matmul).
    ref = (jnp.einsum("oc,nchw->nohw", w1, x) + b1[None, :, None, None]
           + jnp.einsum("oc,nchw->nohw", w2, y) + b2[None, :, None, None])
    assert out.shape == (N, C, H, W)
    assert jnp.allclose(out, ref, atol=1e-5, rtol=1e-5)

    print("KERNEL_OK")
</pallas_src>

<mosaic_0001>
module attributes {stable_mosaic.version = 11 : i64} {
  func.func @_multy_inputs_kernel(%arg0: i32, %arg1: i32, %arg2: memref<2x2xf32, #tpu.memory_space<smem>>, %arg3: memref<2x2xf32, #tpu.memory_space<smem>>, %arg4: memref<2xf32, #tpu.memory_space<smem>>, %arg5: memref<1x2x256xf32, #tpu.memory_space<vmem>>, %arg6: memref<1x2x256xf32, #tpu.memory_space<vmem>>, %arg7: memref<1x2x256xf32, #tpu.memory_space<vmem>>) attributes {dimension_semantics = [#tpu.dimension_semantics<parallel>, #tpu.dimension_semantics<parallel>], iteration_bounds = array<i64: 2, 1>, scalar_prefetch = 0 : i64, scratch_operands = 0 : i64, tpu.core_type = #tpu.core_type<tc>, window_params = [{transform_indices = @transform_0, window_bounds = array<i64: 2, 2>}, {transform_indices = @transform_1, window_bounds = array<i64: 2, 2>}, {transform_indices = @transform_2, window_bounds = array<i64: 2>}, {transform_indices = @transform_3, window_bounds = array<i64: 1, 2, 256>}, {transform_indices = @transform_4, window_bounds = array<i64: 1, 2, 256>}, {transform_indices = @transform_5, window_bounds = array<i64: 1, 2, 256>}]} {
    %c0 = arith.constant 0 : index
    %c0_0 = arith.constant 0 : index
    %c0_1 = arith.constant 0 : index
    %0 = vector.load %arg5[%c0, %c0_0, %c0_1] : memref<1x2x256xf32, #tpu.memory_space<vmem>>, vector<1x1x256xf32>
    %1 = vector.shape_cast %0 : vector<1x1x256xf32> to vector<1x256xf32>
    %c0_2 = arith.constant 0 : index
    %c1 = arith.constant 1 : index
    %c0_3 = arith.constant 0 : index
    %2 = vector.load %arg5[%c0_2, %c1, %c0_3] : memref<1x2x256xf32, #tpu.memory_space<vmem>>, vector<1x1x256xf32>
    %3 = vector.shape_cast %2 : vector<1x1x256xf32> to vector<1x256xf32>
    %c0_4 = arith.constant 0 : index
    %c0_5 = arith.constant 0 : index
    %c0_6 = arith.constant 0 : index
    %4 = vector.load %arg6[%c0_4, %c0_5, %c0_6] : memref<1x2x256xf32, #tpu.memory_space<vmem>>, vector<1x1x256xf32>
    %5 = vector.shape_cast %4 : vector<1x1x256xf32> to vector<1x256xf32>
    %c0_7 = arith.constant 0 : index
    %c1_8 = arith.constant 1 : index
    %c0_9 = arith.constant 0 : index
    %6 = vector.load %arg6[%c0_7, %c1_8, %c0_9] : memref<1x2x256xf32, #tpu.memory_space<vmem>>, vector<1x1x256xf32>
    %7 = vector.shape_cast %6 : vector<1x1x256xf32> to vector<1x256xf32>
    %c0_10 = arith.constant 0 : index
    %c0_11 = arith.constant 0 : index
    %8 = memref.load %arg2[%c0_10, %c0_11] : memref<2x2xf32, #tpu.memory_space<smem>>
    %9 = vector.broadcast %8 : f32 to vector<1x256xf32>
    %10 = arith.mulf %1, %9 : vector<1x256xf32>
    %c0_12 = arith.constant 0 : index
    %c0_13 = arith.constant 0 : index
    %11 = memref.load %arg3[%c0_12, %c0_13] : memref<2x2xf32, #tpu.memory_space<smem>>
    %12 = vector.broadcast %11 : f32 to vector<1x256xf32>
    %13 = arith.mulf %5, %12 : vector<1x256xf32>
    %14 = arith.addf %10, %13 : vector<1x256xf32>
    %c0_14 = arith.constant 0 : index
    %15 = memref.load %arg4[%c0_14] : memref<2xf32, #tpu.memory_space<smem>>
    %16 = vector.broadcast %15 : f32 to vector<1x256xf32>
    %17 = arith.addf %14, %16 : vector<1x256xf32>
    %c0_15 = arith.constant 0 : index
    %c1_16 = arith.constant 1 : index
    %18 = memref.load %arg2[%c0_15, %c1_16] : memref<2x2xf32, #tpu.memory_space<smem>>
    %19 = vector.broadcast %18 : f32 to vector<1x256xf32>
    %20 = arith.mulf %3, %19 : vector<1x256xf32>
    %21 = arith.addf %17, %20 : vector<1x256xf32>
    %c0_17 = arith.constant 0 : index
    %c1_18 = arith.constant 1 : index
    %22 = memref.load %arg3[%c0_17, %c1_18] : memref<2x2xf32, #tpu.memory_space<smem>>
    %23 = vector.broadcast %22 : f32 to vector<1x256xf32>
    %24 = arith.mulf %7, %23 : vector<1x256xf32>
    %25 = arith.addf %21, %24 : vector<1x256xf32>
    %c0_19 = arith.constant 0 : index
    %c0_20 = arith.constant 0 : index
    %c0_21 = arith.constant 0 : index
    %26 = vector.load %arg7[%c0_19, %c0_20, %c0_21] : memref<1x2x256xf32, #tpu.memory_space<vmem>>, vector<1x1x256xf32>
    %27 = vector.shape_cast %26 : vector<1x1x256xf32> to vector<1x256xf32>
    %28 = vector.shape_cast %25 : vector<1x256xf32> to vector<1x1x256xf32>
    tpu.vector_store %arg7[%c0_19, %c0_20, %c0_21], %28 {strides = array<i32>} : memref<1x2x256xf32, #tpu.memory_space<vmem>>, vector<1x1x256xf32>,
    %c1_22 = arith.constant 1 : index
    %c0_23 = arith.constant 0 : index
    %29 = memref.load %arg2[%c1_22, %c0_23] : memref<2x2xf32, #tpu.memory_space<smem>>
    %30 = vector.broadcast %29 : f32 to vector<1x256xf32>
    %31 = arith.mulf %1, %30 : vector<1x256xf32>
    %c1_24 = arith.constant 1 : index
    %c0_25 = arith.constant 0 : index
    %32 = memref.load %arg3[%c1_24, %c0_25] : memref<2x2xf32, #tpu.memory_space<smem>>
    %33 = vector.broadcast %32 : f32 to vector<1x256xf32>
    %34 = arith.mulf %5, %33 : vector<1x256xf32>
    %35 = arith.addf %31, %34 : vector<1x256xf32>
    %c1_26 = arith.constant 1 : index
    %36 = memref.load %arg4[%c1_26] : memref<2xf32, #tpu.memory_space<smem>>
    %37 = vector.broadcast %36 : f32 to vector<1x256xf32>
    %38 = arith.addf %35, %37 : vector<1x256xf32>
    %c1_27 = arith.constant 1 : index
    %c1_28 = arith.constant 1 : index
    %39 = memref.load %arg2[%c1_27, %c1_28] : memref<2x2xf32, #tpu.memory_space<smem>>
    %40 = vector.broadcast %39 : f32 to vector<1x256xf32>
    %41 = arith.mulf %3, %40 : vector<1x256xf32>
    %42 = arith.addf %38, %41 : vector<1x256xf32>
    %c1_29 = arith.constant 1 : index
    %c1_30 = arith.constant 1 : index
    %43 = memref.load %arg3[%c1_29, %c1_30] : memref<2x2xf32, #tpu.memory_space<smem>>
    %44 = vector.broadcast %43 : f32 to vector<1x256xf32>
    %45 = arith.mulf %7, %44 : vector<1x256xf32>
    %46 = arith.addf %42, %45 : vector<1x256xf32>
    %c0_31 = arith.constant 0 : index
    %c1_32 = arith.constant 1 : index
    %c0_33 = arith.constant 0 : index
    %47 = vector.load %arg7[%c0_31, %c1_32, %c0_33] : memref<1x2x256xf32, #tpu.memory_space<vmem>>, vector<1x1x256xf32>
    %48 = vector.shape_cast %47 : vector<1x1x256xf32> to vector<1x256xf32>
    %49 = vector.shape_cast %46 : vector<1x256xf32> to vector<1x1x256xf32>
    tpu.vector_store %arg7[%c0_31, %c1_32, %c0_33], %49 {strides = array<i32>} : memref<1x2x256xf32, #tpu.memory_space<vmem>>, vector<1x1x256xf32>,
    return
  }
  func.func @transform_0(%arg0: i32, %arg1: i32) -> (i32, i32) {
    %c0_i32 = arith.constant 0 : i32
    %c0_i32_0 = arith.constant 0 : i32
    %c0_i32_1 = arith.constant 0 : i32
    return %c0_i32, %c0_i32_0 : i32, i32
  }
  func.func @transform_1(%arg0: i32, %arg1: i32) -> (i32, i32) {
    %c0_i32 = arith.constant 0 : i32
    %c0_i32_0 = arith.constant 0 : i32
    %c0_i32_1 = arith.constant 0 : i32
    return %c0_i32, %c0_i32_0 : i32, i32
  }
  func.func @transform_2(%arg0: i32, %arg1: i32) -> i32 {
    %c0_i32 = arith.constant 0 : i32
    %c0_i32_0 = arith.constant 0 : i32
    return %c0_i32 : i32
  }
  func.func @transform_3(%arg0: i32, %arg1: i32) -> (i32, i32, i32) {
    %c0_i32 = arith.constant 0 : i32
    %c0_i32_0 = arith.constant 0 : i32
    return %arg0, %c0_i32, %arg1 : i32, i32, i32
  }
  func.func @transform_4(%arg0: i32, %arg1: i32) -> (i32, i32, i32) {
    %c0_i32 = arith.constant 0 : i32
    %c0_i32_0 = arith.constant 0 : i32
    return %arg0, %c0_i32, %arg1 : i32, i32, i32
  }
  func.func @transform_5(%arg0: i32, %arg1: i32) -> (i32, i32, i32) {
    %c0_i32 = arith.constant 0 : i32
    %c0_i32_0 = arith.constant 0 : i32
    return %arg0, %c0_i32, %arg1 : i32, i32, i32
  }
}

</mosaic_0001>

<bundles_post_ra>
// kernel: multy_inputs.1
= control target key start
LH: loop header
LB: loop body
LE: loop exit
PB: predicated region body
PF: predicated region fallthrough
CT: control target
= control target key end

     0   :  { %10 = vsyncpa [#allocation3], 0  ;;  %s820_s0 = inlined_call_operand.vmem [shape: f32[2,2], index: 0, kind: input, shape index: {}]   ;;  %s821_s1 = inlined_call_operand.vmem [shape: f32[2,2], index: 1, kind: input, shape index: {}]   ;;  %s822_s2 = inlined_call_operand.vmem [shape: f32[2], index: 2, kind: input, shape index: {}]   ;;  %s823_s3 = inlined_call_operand.vmem [shape: f32[2,2,256], index: 3, kind: input, shape index: {}]   ;;  %s824_s4 = inlined_call_operand.vmem [shape: f32[2,2,256], index: 4, kind: input, shape index: {}]   ;;  %s825_s5 = inlined_call_operand.vmem [shape: f32[2,2,256], index: 5, kind: output, shape index: {}]  }
   0x1   :  { %11 = vsyncpa [#allocation5], 0  ;;  %s721_s18 = smov 0   ;;  %s723_s19 = smov 0  }
   0x2   :  { %s725_s20 = smov 0  }
   0x3 LB: > { %s205_s23 = sshll.u32 %s821_s1, 4  ;;  %s524_s24 = sadd.s32 4294967295, %s686_s20   ;;  %s686_s20 = sphi %s725_s20, %s17_s20   ;;  %s682_s19 = sphi %s723_s19, %s836_s19   ;;  %s678_s18 = sphi %s721_s18, %s835_s18   ;;  %s206_s23 = int_to_ptr.vmem [resolvable:$true] %s205_s23 }
   0x4   : > { %p526_p0 = scmp.ge.s32.totalorder %s686_s20, 1  ;;  %p181_p1 = scmp.lt.s32.totalorder %s686_s20, 3 }
   0x5   : > { %p742_p2 = scmp.eq.s32.totalorder %s524_s24, 0  ;;  %s29_s27 = sadd.s32 1, %s682_s19 }
   0x6   : > { %p746_p3 = pnand %p526_p0, %p181_p1  ;;  %s194_s30 = sshll.u32 %s820_s0, 4  ;;  %s195_s30 = int_to_ptr.vmem [resolvable:$true] %s194_s30 }
   0x7   : > { %s829_s25 = scalar_select %p742_p2, 1, 0 }
   0x8   : > { %s830_s26 = scalar_select %p746_p3, 1, 0 }
   0x9   : > { %p568_p4 = pneg %p746_p3  ;;  %p762_p6 = scmp.ge.s32.totalorder %s29_s27, 2 }
   0xa   : > { %s216_s10 = sshll.u32 %s822_s2, 4  ;;  %s611_s11 = scalar_lea.vmem %s206_s23, 32  ;;  %s217_s10 = int_to_ptr.vmem [resolvable:$true] %s216_s10 }
   0xb   : > { %p758_p5 = pnand %p742_p2, %p568_p4  ;;  %p612_p7 = scmp.ne.s32.totalorder %s206_s23, %s611_s11 }
   0xc   : > { %p619_p11 = scmp.lt.s32.totalorder %s206_s23, %s206_s23  ;;  %p620_p12 = scmp.lt.s32.totalorder %s611_s11, %s611_s11 }
   0xd   : > { %p613_p8 = pneg %p758_p5 }
   0xe   : > { %p621_p13 = por %p620_p12, %p619_p11 }
   0xf   : > { %p614_p9 = pnand %p613_p8, %p612_p7 }
  0x11   : > { %p615_p10 = pneg %p614_p9 }
  0x13   : > { %p622_p0 = pnand %p621_p13, %p615_p10 }
  0x15   : > { %625 = shalt.err (!%p622_p0)
}
  0x16   : > { %s688_s12 = smov [#allocation4]   ;;  %s838_s27 = smov (%p762_p6, %s29_s27), 0 }
  0x17   : > { %574 = dma.vmem_to_smem (!%p758_p5), %s206_s23, 32, %s688_s12, [#allocation5]  }
  0x18   : > { %s626_s13 = scalar_lea.vmem %s195_s30, 32  ;;  %p634_p9 = scmp.lt.s32.totalorder %s195_s30, %s195_s30 }
  0x19   : > { %p627_p1 = scmp.ne.s32.totalorder %s195_s30, %s626_s13  ;;  %p635_p2 = scmp.lt.s32.totalorder %s626_s13, %s626_s13 }
  0x1b   : > { %p629_p4 = pnand %p627_p1, %p613_p8  ;;  %p636_p11 = por %p635_p2, %p634_p9 }
  0x1d   : > { %p630_p7 = pneg %p629_p4 }
  0x1f   : > { %p637_p10 = pnand %p636_p11, %p630_p7 }
  0x21   : > { %640 = shalt.err (!%p637_p10)
}
  0x22   : > { %s689_s14 = smov [#allocation2]   ;;  %s641_s15 = scalar_lea.vmem %s217_s10, 16 }
  0x23   : > { %571 = dma.vmem_to_smem (!%p758_p5), %s195_s30, 32, %s689_s14, [#allocation3]  }
  0x24   : > { %p642_p6 = scmp.ne.s32.totalorder %s217_s10, %s641_s15  ;;  %p649_p0 = scmp.lt.s32.totalorder %s217_s10, %s217_s10 }
  0x25   : > { %p650_p1 = scmp.lt.s32.totalorder %s641_s15, %s641_s15 }
  0x26   : > { %p644_p12 = pnand %p642_p6, %p613_p8 }
  0x27   : > { %p651_p4 = por %p650_p1, %p649_p0 }
  0x28   : > { %p645_p13 = pneg %p644_p12 }
  0x2a   : > { %p652_p3 = pnand %p651_p4, %p645_p13 }
  0x2c   : > { %655 = shalt.err (!%p652_p3)
}
  0x2d   : > { %s690_s16 = smov [#allocation6]   ;;  %p833_p2 = scmp.ne.s32.totalorder %s830_s26, 0 }
  0x2e   : > { %577 = dma.vmem_to_smem (!%p758_p5), %s217_s10, 16, %s690_s16, [#allocation5]  }
  0x2f   : > { %255 = sbr.rel (%p833_p2) target bundleno = 84 (0x54), region = 40  ;;  %p834_p7 = scmp.ne.s32.totalorder (!%p833_p2), %s829_s25, 0 }
  0x36   : > { %669 = dma.done.wait (%p834_p7), [#allocation3], 32  }
  0x37   : > { %671 = vsyncadd (%p834_p7), [#allocation3], 4294967264 }
  0x38   : > { %673 = dma.done.wait (%p834_p7), [#allocation5], 48  }
  0x39   : > { %675 = vsyncadd (%p834_p7), [#allocation5], 4294967248 }
  0x3a   : > { %269 = sfence }
  0x3b   : > { %p310_p3 = scmp.lt.s32.totalorder %s678_s18, 1  ;;  %s345_s17 = sld [smem:[#allocation2]]  ;;  %v363_v14 = vlaneseq }
  0x3c   : > { %s348_s21 = sld [smem:[#allocation4]]  ;;  %s543_s23 = sld [smem:[#allocation2 + $0x1]] }
  0x3d   : > { %s352_s22 = sld [smem:[#allocation6]]  ;;  %s840_s18 = smov (!%p310_p3, %s678_s18), 1  ;;  %vm365_vm0 = vcmp.lt.s32.totalorder %v363_v14, 256 }
  0x3e   : > { %s544_s24 = sld [smem:[#allocation4 + $0x1]]  ;;  %s553_s26 = sshll.u32 %s840_s18, 2 }
  0x3f   : > { %s545_s28 = sld [smem:[#allocation2 + $0x80]]  ;;  %s317_s6 = scalar_lea.vmem %s823_s3, %s553_s26 }
  0x40   : > { %s327_s25 = scalar_lea.vmem %s824_s4, %s553_s26  ;;  %v339_v0 = vld [vmem:[%s317_s6] ss:$2 sm:$0x3]  ;;  %v541_v1 = vld [vmem:[%s317_s6 + $0x1] ss:$2 sm:$0x3]  ;;  %s337_s14 = scalar_lea.vmem %s825_s5, %s553_s26 }
  0x41   : > { %v346_v2 = vstv %s345_s17  ;;  %v342_v3 = vld [vmem:[%s327_s25] ss:$2 sm:$0x3]  ;;  %v542_v4 = vld [vmem:[%s327_s25 + $0x1] ss:$2 sm:$0x3] }
  0x42   : > { %v347_v5 = vmul.f32 %v346_v2, %v339_v0  ;;  %v349_v6 = vstv %s348_s21  ;;  %s546_s9 = sld [smem:[#allocation4 + $0x80]]  ;;  %s547_s10 = sld [smem:[#allocation6 + $0x1]]  ;;  %v356_v9 = vstv %s543_s23 }
  0x43   : > { %v350_v7 = vmul.f32 %v349_v6, %v342_v3  ;;  %v353_v8 = vstv %s352_s22  ;;  %s548_s18 = sld [smem:[#allocation2 + $0x81]]  ;;  %v357_v12 = vmul.f32 %v541_v1, %v356_v9 }
  0x44   : > { %v360_v10 = vstv %s544_s24  ;;  %s549_s11 = sld [smem:[#allocation4 + $0x81]] }
  0x45   : > { %v351_v11 = vadd.f32 %v350_v7, %v347_v5  ;;  %v369_v13 = vstv %s545_s28  ;;  %v361_v16 = vmul.f32 %v542_v4, %v360_v10 }
  0x46   : > { %v370_v17 = vmul.f32 %v369_v13, %v339_v0 }
  0x47   : > { %v354_v15 = vadd.f32 %v353_v8, %v351_v11 }
  0x48   : > { %v372_v19 = vstv %s546_s9  ;;  %v376_v23 = vstv %s547_s10 }
  0x49   : > { %v358_v18 = vadd.f32 %v357_v12, %v354_v15  ;;  %v373_v20 = vmul.f32 %v372_v19, %v342_v3  ;;  %v379_v21 = vstv %s548_s18 }
  0x4a   : > { %v383_v24 = vstv %s549_s11  ;;  %v380_v26 = vmul.f32 %v541_v1, %v379_v21 }
  0x4b   : > { %v362_v22 = vadd.f32 %v361_v16, %v358_v18  ;;  %v374_v25 = vadd.f32 %v373_v20, %v370_v17  ;;  %v384_v28 = vmul.f32 %v542_v4, %v383_v24 }
  0x4d   : > { %367 = vst.msk [vmem:[%s337_s14] ss:$2 sm:$0x3] %vm365_vm0, %v362_v22  ;;  %v377_v27 = vadd.f32 %v376_v23, %v374_v25 }
  0x4f   : > { %v381_v29 = vadd.f32 %v380_v26, %v377_v27 }
  0x51   : > { %v385_v30 = vadd.f32 %v384_v28, %v381_v29 }
  0x53   : > { %550 = vst.msk [vmem:[%s337_s14 + $0x1] ss:$2 sm:$0x3] %vm365_vm0, %v385_v30 }
  0x54 PF: > { %s17_s20 = sadd.s32 1, %s686_s20   ;;  %s835_s18 = smov %s682_s19 }
  0x55   : > { %p14_p5 = scmp.ge.s32.totalorder %s17_s20, 4   ;;  %s836_s19 = smov %s838_s27 }
  0x57   :  { %16 = sbr.rel (!%p14_p5) target bundleno = 3 (0x3), region = 89 }
  0x5e   :  { %418 = vsyncpa [#allocation3], 1 }
  0x5f   :  { %420 = vsyncpa [#allocation3 + $0x1], 1 }
  0x60   :  { %421 = vsyncpa [#allocation5], 1 }

</bundles_post_ra>
